<compile_context>
chip_gen: v7x
topology: tpu7x:2x2x1
jax: 0.10.0
libtpu: 0.0.40
codegen_flags: <defaults>
</compile_context>

<pallas_src>
import functools
import jax
import jax.numpy as jnp
from jax.experimental import pallas as pl

LANE = 128


def _round_up(x, m):
    return ((x + m - 1) // m) * m


# ----------------------------- fused Pallas kernel ------------------------------

def _global_classifier_kernel(emb_ref, a1_ref, a2_ref, w1_ref, b1_ref,
                              w2_ref, b2_ref, o_ref, *, num_relations):
    R = num_relations

    # --- global readout #1:  x = emb + mean(emb, axis=0)
    x = emb_ref[...]
    x = x + jnp.mean(x, axis=0, keepdims=True)

    # --- rgc1 (horizontal stacking):
    #     out = sum_r A1_r @ (x @ W1_r) + b1  ==  A1_cat @ vstack_r(x @ W1_r) + b1
    xw = jnp.concatenate(
        [jnp.dot(x, w1_ref[r], preferred_element_type=jnp.float32)
         for r in range(R)],
        axis=0)                                              # (R*N, Dhid_pad)
    h = jnp.dot(a1_ref[...], xw,
                preferred_element_type=jnp.float32) + b1_ref[...]

    # --- global readout #2 + relu
    h = h + jnp.mean(h, axis=0, keepdims=True)
    h = jnp.maximum(h, 0.0)

    # --- rgc2 (vertical stacking; same algebra, row-normalized adjacency):
    hw = jnp.concatenate(
        [jnp.dot(h, w2_ref[r], preferred_element_type=jnp.float32)
         for r in range(R)],
        axis=0)                                              # (R*N, Dcls_pad)
    o_ref[...] = jnp.dot(a2_ref[...], hw,
                         preferred_element_type=jnp.float32) + b2_ref[...]


@jax.jit
def global_node_classifier_forward(emb, A_h, A_v, W1, b1, W2, b2):
    """Fused forward pass.  A_h/A_v: (R, N, N) dense normalized adjacencies."""
    N, _ = emb.shape
    R, _, dhid = W1.shape
    dcls = W2.shape[2]
    dhid_p = _round_up(dhid, LANE)
    dcls_p = _round_up(dcls, LANE)

    # Horizontal concatenation of per-relation adjacencies: A_cat[n, r*N + m] = A[r, n, m].
    A1_cat = jnp.transpose(A_h, (1, 0, 2)).reshape(N, R * N)
    A2_cat = jnp.transpose(A_v, (1, 0, 2)).reshape(N, R * N)

    # Zero-pad feature dims to 128 lanes (layout plumbing only; sliced off below).
    W1p = jnp.pad(W1, ((0, 0), (0, 0), (0, dhid_p - dhid)))
    b1p = jnp.pad(b1, (0, dhid_p - dhid)).reshape(1, dhid_p)
    W2p = jnp.pad(W2, ((0, 0), (0, dhid_p - dhid), (0, dcls_p - dcls)))
    b2p = jnp.pad(b2, (0, dcls_p - dcls)).reshape(1, dcls_p)

    out_p = pl.pallas_call(
        functools.partial(_global_classifier_kernel, num_relations=R),
        out_shape=jax.ShapeDtypeStruct((N, dcls_p), jnp.float32),
    )(emb, A1_cat, A2_cat, W1p, b1p, W2p, b2p)
    return out_p[:, :dcls]


# ------------------------------ JAX glue ------------------------------------

def add_inverse_and_self(triples, num_nodes, num_rels):
    """Mirror of torch_rgcn.utils.add_inverse_and_self."""
    inverse = jnp.stack(
        [triples[:, 2], triples[:, 1] + num_rels, triples[:, 0]], axis=1)
    all_nodes = jnp.arange(num_nodes, dtype=triples.dtype)
    self_loops = jnp.stack(
        [all_nodes, jnp.full((num_nodes,), 2 * num_rels, dtype=triples.dtype),
         all_nodes], axis=1)
    return jnp.concatenate([triples, inverse, self_loops], axis=0)


def build_normalized_adjacencies(triples_plus, num_nodes, num_relations, num_orig_edges):
    """Dense per-relation normalized adjacencies for both stackings.

    Replicates stack_matrices + sum_sparse (+ the column-norm reorder trick of
    the horizontally-stacked layer) from torch_rgcn.
    """
    s = triples_plus[:, 0]
    p = triples_plus[:, 1]
    o = triples_plus[:, 2]
    N, R, E = num_nodes, num_relations, num_orig_edges

    # --- rgc1: horizontal stacking, column-wise normalization + reorder trick
    col_idx = p * N + o
    col_counts = jnp.zeros((R * N,), jnp.float32).at[col_idx].add(1.0)
    sums_h = col_counts[col_idx]
    # sums = cat([sums[n:2n], sums[:n], sums[-i:]]) with n=E (general edges), i=N (self loops)
    sums_h = jnp.concatenate([sums_h[E:2 * E], sums_h[:E], sums_h[2 * E:]])
    vals_h = 1.0 / sums_h
    A_h = jnp.zeros((R, N, N), jnp.float32).at[p, s, o].add(vals_h)

    # --- rgc2: vertical stacking, row-wise normalization
    row_idx = p * N + s
    row_counts = jnp.zeros((R * N,), jnp.float32).at[row_idx].add(1.0)
    sums_v = row_counts[row_idx]
    vals_v = 1.0 / sums_v
    A_v = jnp.zeros((R, N, N), jnp.float32).at[p, s, o].add(vals_v)

    return A_h, A_v


def glorot_uniform(key, shape, fan_in, fan_out):
    limit = jnp.sqrt(6.0 / (fan_in + fan_out))
    return jax.random.uniform(key, shape, jnp.float32, -limit, limit)


# ------------------------------- main ---------------------------------------

if __name__ == "__main__":
    # Small deterministic problem instance.
    nnodes, nrel, nemb, nhid, nclass = 32, 3, 32, 16, 8
    nfeat = nemb
    num_relations = 2 * nrel + 1
    num_edges = 40

    key = jax.random.PRNGKey(0)
    k_s, k_p, k_o, k_emb, k_w1, k_w2 = jax.random.split(key, 6)

    heads = jax.random.randint(k_s, (num_edges,), 0, nnodes, dtype=jnp.int32)
    rels = jax.random.randint(k_p, (num_edges,), 0, nrel, dtype=jnp.int32)
    tails = jax.random.randint(k_o, (num_edges,), 0, nnodes, dtype=jnp.int32)
    triples = jnp.stack([heads, rels, tails], axis=1)

    triples_plus = add_inverse_and_self(triples, nnodes, nrel)
    A_h, A_v = build_normalized_adjacencies(
        triples_plus, nnodes, num_relations, num_edges)

    # Parameters (deterministic glorot-uniform weights, zero biases).
    node_embeddings = glorot_uniform(k_emb, (nnodes, nemb), nnodes, nemb)
    W1 = glorot_uniform(k_w1, (num_relations, nfeat, nhid), nfeat, nhid)
    b1 = jnp.zeros((nhid,), jnp.float32)
    W2 = glorot_uniform(k_w2, (num_relations, nhid, nclass), nhid, nclass)
    b2 = jnp.zeros((nclass,), jnp.float32)

    # TODO(synk): edge_dropout is a training-only op in the reference; eval-mode forward has none.

    out = global_node_classifier_forward(
        node_embeddings, A_h, A_v, W1, b1, W2, b2)
    jax.block_until_ready(out)
    assert out.shape == (nnodes, nclass)
    print("KERNEL_OK")
</pallas_src>

<mosaic_0001>
module attributes {stable_mosaic.version = 11 : i64} {
  func.func @_global_classifier_kernel(%arg0: memref<32x32xf32, #tpu.memory_space<vmem>>, %arg1: memref<32x224xf32, #tpu.memory_space<vmem>>, %arg2: memref<32x224xf32, #tpu.memory_space<vmem>>, %arg3: memref<7x32x128xf32, #tpu.memory_space<vmem>>, %arg4: memref<1x128xf32, #tpu.memory_space<vmem>>, %arg5: memref<7x128x128xf32, #tpu.memory_space<vmem>>, %arg6: memref<1x128xf32, #tpu.memory_space<vmem>>, %arg7: memref<32x128xf32, #tpu.memory_space<vmem>>) attributes {dimension_semantics = [], scalar_prefetch = 0 : i64, scratch_operands = 0 : i64, tpu.core_type = #tpu.core_type<tc>} {
    %c0 = arith.constant 0 : index
    %c0_0 = arith.constant 0 : index
    %0 = vector.load %arg0[%c0, %c0_0] : memref<32x32xf32, #tpu.memory_space<vmem>>, vector<32x32xf32>
    %cst = arith.constant dense<0.000000e+00> : vector<32xf32>
    %1 = vector.multi_reduction <add>, %0, %cst [0] : vector<32x32xf32> to vector<32xf32>
    %2 = vector.shape_cast %1 : vector<32xf32> to vector<1x32xf32>
    %cst_1 = arith.constant 3.200000e+01 : f32
    %3 = vector.broadcast %cst_1 : f32 to vector<1x32xf32>
    %4 = arith.divf %2, %3 : vector<1x32xf32>
    %5 = vector.broadcast %4 : vector<1x32xf32> to vector<32x32xf32>
    %6 = arith.addf %0, %5 : vector<32x32xf32>
    %c0_2 = arith.constant 0 : index
    %c0_3 = arith.constant 0 : index
    %c0_4 = arith.constant 0 : index
    %7 = vector.load %arg3[%c0_2, %c0_3, %c0_4] : memref<7x32x128xf32, #tpu.memory_space<vmem>>, vector<1x32x128xf32>
    %8 = vector.shape_cast %7 : vector<1x32x128xf32> to vector<32x128xf32>
    %cst_5 = arith.constant dense<0.000000e+00> : vector<32x128xf32>
    %9 = tpu.matmul %6, %8, %cst_5 {dimension_numbers = #tpu.dot_dimension_numbers<[1], [0], [0], [1], [0, 0, 1, 1], [], []>} : vector<32x32xf32>, vector<32x128xf32>, vector<32x128xf32> -> vector<32x128xf32>
    %c1 = arith.constant 1 : index
    %c0_6 = arith.constant 0 : index
    %c0_7 = arith.constant 0 : index
    %10 = vector.load %arg3[%c1, %c0_6, %c0_7] : memref<7x32x128xf32, #tpu.memory_space<vmem>>, vector<1x32x128xf32>
    %11 = vector.shape_cast %10 : vector<1x32x128xf32> to vector<32x128xf32>
    %cst_8 = arith.constant dense<0.000000e+00> : vector<32x128xf32>
    %12 = tpu.matmul %6, %11, %cst_8 {dimension_numbers = #tpu.dot_dimension_numbers<[1], [0], [0], [1], [0, 0, 1, 1], [], []>} : vector<32x32xf32>, vector<32x128xf32>, vector<32x128xf32> -> vector<32x128xf32>
    %c2 = arith.constant 2 : index
    %c0_9 = arith.constant 0 : index
    %c0_10 = arith.constant 0 : index
    %13 = vector.load %arg3[%c2, %c0_9, %c0_10] : memref<7x32x128xf32, #tpu.memory_space<vmem>>, vector<1x32x128xf32>
    %14 = vector.shape_cast %13 : vector<1x32x128xf32> to vector<32x128xf32>
    %cst_11 = arith.constant dense<0.000000e+00> : vector<32x128xf32>
    %15 = tpu.matmul %6, %14, %cst_11 {dimension_numbers = #tpu.dot_dimension_numbers<[1], [0], [0], [1], [0, 0, 1, 1], [], []>} : vector<32x32xf32>, vector<32x128xf32>, vector<32x128xf32> -> vector<32x128xf32>
    %c3 = arith.constant 3 : index
    %c0_12 = arith.constant 0 : index
    %c0_13 = arith.constant 0 : index
    %16 = vector.load %arg3[%c3, %c0_12, %c0_13] : memref<7x32x128xf32, #tpu.memory_space<vmem>>, vector<1x32x128xf32>
    %17 = vector.shape_cast %16 : vector<1x32x128xf32> to vector<32x128xf32>
    %cst_14 = arith.constant dense<0.000000e+00> : vector<32x128xf32>
    %18 = tpu.matmul %6, %17, %cst_14 {dimension_numbers = #tpu.dot_dimension_numbers<[1], [0], [0], [1], [0, 0, 1, 1], [], []>} : vector<32x32xf32>, vector<32x128xf32>, vector<32x128xf32> -> vector<32x128xf32>
    %c4 = arith.constant 4 : index
    %c0_15 = arith.constant 0 : index
    %c0_16 = arith.constant 0 : index
    %19 = vector.load %arg3[%c4, %c0_15, %c0_16] : memref<7x32x128xf32, #tpu.memory_space<vmem>>, vector<1x32x128xf32>
    %20 = vector.shape_cast %19 : vector<1x32x128xf32> to vector<32x128xf32>
    %cst_17 = arith.constant dense<0.000000e+00> : vector<32x128xf32>
    %21 = tpu.matmul %6, %20, %cst_17 {dimension_numbers = #tpu.dot_dimension_numbers<[1], [0], [0], [1], [0, 0, 1, 1], [], []>} : vector<32x32xf32>, vector<32x128xf32>, vector<32x128xf32> -> vector<32x128xf32>
    %c5 = arith.constant 5 : index
    %c0_18 = arith.constant 0 : index
    %c0_19 = arith.constant 0 : index
    %22 = vector.load %arg3[%c5, %c0_18, %c0_19] : memref<7x32x128xf32, #tpu.memory_space<vmem>>, vector<1x32x128xf32>
    %23 = vector.shape_cast %22 : vector<1x32x128xf32> to vector<32x128xf32>
    %cst_20 = arith.constant dense<0.000000e+00> : vector<32x128xf32>
    %24 = tpu.matmul %6, %23, %cst_20 {dimension_numbers = #tpu.dot_dimension_numbers<[1], [0], [0], [1], [0, 0, 1, 1], [], []>} : vector<32x32xf32>, vector<32x128xf32>, vector<32x128xf32> -> vector<32x128xf32>
    %c6 = arith.constant 6 : index
    %c0_21 = arith.constant 0 : index
    %c0_22 = arith.constant 0 : index
    %25 = vector.load %arg3[%c6, %c0_21, %c0_22] : memref<7x32x128xf32, #tpu.memory_space<vmem>>, vector<1x32x128xf32>
    %26 = vector.shape_cast %25 : vector<1x32x128xf32> to vector<32x128xf32>
    %cst_23 = arith.constant dense<0.000000e+00> : vector<32x128xf32>
    %27 = tpu.matmul %6, %26, %cst_23 {dimension_numbers = #tpu.dot_dimension_numbers<[1], [0], [0], [1], [0, 0, 1, 1], [], []>} : vector<32x32xf32>, vector<32x128xf32>, vector<32x128xf32> -> vector<32x128xf32>
    %28 = tpu.concatenate %9, %12, %15, %18, %21, %24, %27 in 0 : vector<32x128xf32>, vector<32x128xf32>, vector<32x128xf32>, vector<32x128xf32>, vector<32x128xf32>, vector<32x128xf32>, vector<32x128xf32> -> vector<224x128xf32>
    %c0_24 = arith.constant 0 : index
    %c0_25 = arith.constant 0 : index
    %29 = vector.load %arg1[%c0_24, %c0_25] : memref<32x224xf32, #tpu.memory_space<vmem>>, vector<32x224xf32>
    %cst_26 = arith.constant dense<0.000000e+00> : vector<32x128xf32>
    %30 = tpu.matmul %29, %28, %cst_26 {dimension_numbers = #tpu.dot_dimension_numbers<[1], [0], [0], [1], [0, 0, 1, 1], [], []>} : vector<32x224xf32>, vector<224x128xf32>, vector<32x128xf32> -> vector<32x128xf32>
    %c0_27 = arith.constant 0 : index
    %c0_28 = arith.constant 0 : index
    %31 = vector.load %arg4[%c0_27, %c0_28] : memref<1x128xf32, #tpu.memory_space<vmem>>, vector<1x128xf32>
    %32 = vector.broadcast %31 : vector<1x128xf32> to vector<32x128xf32>
    %33 = arith.addf %30, %32 : vector<32x128xf32>
    %cst_29 = arith.constant dense<0.000000e+00> : vector<128xf32>
    %34 = vector.multi_reduction <add>, %33, %cst_29 [0] : vector<32x128xf32> to vector<128xf32>
    %35 = vector.shape_cast %34 : vector<128xf32> to vector<1x128xf32>
    %cst_30 = arith.constant 3.200000e+01 : f32
    %36 = vector.broadcast %cst_30 : f32 to vector<1x128xf32>
    %37 = arith.divf %35, %36 : vector<1x128xf32>
    %38 = vector.broadcast %37 : vector<1x128xf32> to vector<32x128xf32>
    %39 = arith.addf %33, %38 : vector<32x128xf32>
    %cst_31 = arith.constant 0.000000e+00 : f32
    %40 = vector.broadcast %cst_31 : f32 to vector<32x128xf32>
    %41 = arith.maximumf %39, %40 : vector<32x128xf32>
    %c0_32 = arith.constant 0 : index
    %c0_33 = arith.constant 0 : index
    %c0_34 = arith.constant 0 : index
    %42 = vector.load %arg5[%c0_32, %c0_33, %c0_34] : memref<7x128x128xf32, #tpu.memory_space<vmem>>, vector<1x128x128xf32>
    %43 = vector.shape_cast %42 : vector<1x128x128xf32> to vector<128x128xf32>
    %cst_35 = arith.constant dense<0.000000e+00> : vector<32x128xf32>
    %44 = tpu.matmul %41, %43, %cst_35 {dimension_numbers = #tpu.dot_dimension_numbers<[1], [0], [0], [1], [0, 0, 1, 1], [], []>} : vector<32x128xf32>, vector<128x128xf32>, vector<32x128xf32> -> vector<32x128xf32>
    %c1_36 = arith.constant 1 : index
    %c0_37 = arith.constant 0 : index
    %c0_38 = arith.constant 0 : index
    %45 = vector.load %arg5[%c1_36, %c0_37, %c0_38] : memref<7x128x128xf32, #tpu.memory_space<vmem>>, vector<1x128x128xf32>
    %46 = vector.shape_cast %45 : vector<1x128x128xf32> to vector<128x128xf32>
    %cst_39 = arith.constant dense<0.000000e+00> : vector<32x128xf32>
    %47 = tpu.matmul %41, %46, %cst_39 {dimension_numbers = #tpu.dot_dimension_numbers<[1], [0], [0], [1], [0, 0, 1, 1], [], []>} : vector<32x128xf32>, vector<128x128xf32>, vector<32x128xf32> -> vector<32x128xf32>
    %c2_40 = arith.constant 2 : index
    %c0_41 = arith.constant 0 : index
    %c0_42 = arith.constant 0 : index
    %48 = vector.load %arg5[%c2_40, %c0_41, %c0_42] : memref<7x128x128xf32, #tpu.memory_space<vmem>>, vector<1x128x128xf32>
    %49 = vector.shape_cast %48 : vector<1x128x128xf32> to vector<128x128xf32>
    %cst_43 = arith.constant dense<0.000000e+00> : vector<32x128xf32>
    %50 = tpu.matmul %41, %49, %cst_43 {dimension_numbers = #tpu.dot_dimension_numbers<[1], [0], [0], [1], [0, 0, 1, 1], [], []>} : vector<32x128xf32>, vector<128x128xf32>, vector<32x128xf32> -> vector<32x128xf32>
    %c3_44 = arith.constant 3 : index
    %c0_45 = arith.constant 0 : index
    %c0_46 = arith.constant 0 : index
    %51 = vector.load %arg5[%c3_44, %c0_45, %c0_46] : memref<7x128x128xf32, #tpu.memory_space<vmem>>, vector<1x128x128xf32>
    %52 = vector.shape_cast %51 : vector<1x128x128xf32> to vector<128x128xf32>
    %cst_47 = arith.constant dense<0.000000e+00> : vector<32x128xf32>
    %53 = tpu.matmul %41, %52, %cst_47 {dimension_numbers = #tpu.dot_dimension_numbers<[1], [0], [0], [1], [0, 0, 1, 1], [], []>} : vector<32x128xf32>, vector<128x128xf32>, vector<32x128xf32> -> vector<32x128xf32>
    %c4_48 = arith.constant 4 : index
    %c0_49 = arith.constant 0 : index
    %c0_50 = arith.constant 0 : index
    %54 = vector.load %arg5[%c4_48, %c0_49, %c0_50] : memref<7x128x128xf32, #tpu.memory_space<vmem>>, vector<1x128x128xf32>
    %55 = vector.shape_cast %54 : vector<1x128x128xf32> to vector<128x128xf32>
    %cst_51 = arith.constant dense<0.000000e+00> : vector<32x128xf32>
    %56 = tpu.matmul %41, %55, %cst_51 {dimension_numbers = #tpu.dot_dimension_numbers<[1], [0], [0], [1], [0, 0, 1, 1], [], []>} : vector<32x128xf32>, vector<128x128xf32>, vector<32x128xf32> -> vector<32x128xf32>
    %c5_52 = arith.constant 5 : index
    %c0_53 = arith.constant 0 : index
    %c0_54 = arith.constant 0 : index
    %57 = vector.load %arg5[%c5_52, %c0_53, %c0_54] : memref<7x128x128xf32, #tpu.memory_space<vmem>>, vector<1x128x128xf32>
    %58 = vector.shape_cast %57 : vector<1x128x128xf32> to vector<128x128xf32>
    %cst_55 = arith.constant dense<0.000000e+00> : vector<32x128xf32>
    %59 = tpu.matmul %41, %58, %cst_55 {dimension_numbers = #tpu.dot_dimension_numbers<[1], [0], [0], [1], [0, 0, 1, 1], [], []>} : vector<32x128xf32>, vector<128x128xf32>, vector<32x128xf32> -> vector<32x128xf32>
    %c6_56 = arith.constant 6 : index
    %c0_57 = arith.constant 0 : index
    %c0_58 = arith.constant 0 : index
    %60 = vector.load %arg5[%c6_56, %c0_57, %c0_58] : memref<7x128x128xf32, #tpu.memory_space<vmem>>, vector<1x128x128xf32>
    %61 = vector.shape_cast %60 : vector<1x128x128xf32> to vector<128x128xf32>
    %cst_59 = arith.constant dense<0.000000e+00> : vector<32x128xf32>
    %62 = tpu.matmul %41, %61, %cst_59 {dimension_numbers = #tpu.dot_dimension_numbers<[1], [0], [0], [1], [0, 0, 1, 1], [], []>} : vector<32x128xf32>, vector<128x128xf32>, vector<32x128xf32> -> vector<32x128xf32>
    %63 = tpu.concatenate %44, %47, %50, %53, %56, %59, %62 in 0 : vector<32x128xf32>, vector<32x128xf32>, vector<32x128xf32>, vector<32x128xf32>, vector<32x128xf32>, vector<32x128xf32>, vector<32x128xf32> -> vector<224x128xf32>
    %c0_60 = arith.constant 0 : index
    %c0_61 = arith.constant 0 : index
    %64 = vector.load %arg2[%c0_60, %c0_61] : memref<32x224xf32, #tpu.memory_space<vmem>>, vector<32x224xf32>
    %cst_62 = arith.constant dense<0.000000e+00> : vector<32x128xf32>
    %65 = tpu.matmul %64, %63, %cst_62 {dimension_numbers = #tpu.dot_dimension_numbers<[1], [0], [0], [1], [0, 0, 1, 1], [], []>} : vector<32x224xf32>, vector<224x128xf32>, vector<32x128xf32> -> vector<32x128xf32>
    %c0_63 = arith.constant 0 : index
    %c0_64 = arith.constant 0 : index
    %66 = vector.load %arg6[%c0_63, %c0_64] : memref<1x128xf32, #tpu.memory_space<vmem>>, vector<1x128xf32>
    %67 = vector.broadcast %66 : vector<1x128xf32> to vector<32x128xf32>
    %68 = arith.addf %65, %67 : vector<32x128xf32>
    %c0_65 = arith.constant 0 : index
    %c0_66 = arith.constant 0 : index
    %69 = vector.load %arg7[%c0_65, %c0_66] : memref<32x128xf32, #tpu.memory_space<vmem>>, vector<32x128xf32>
    tpu.vector_store %arg7[%c0_65, %c0_66], %68 {strides = array<i32>} : memref<32x128xf32, #tpu.memory_space<vmem>>, vector<32x128xf32>,
    return
  }
}

</mosaic_0001>

<bundles_post_ra>
// kernel: global_node_classifier_forward.1
= control target key start
LH: loop header
LB: loop body
LE: loop exit
PB: predicated region body
PF: predicated region fallthrough
CT: control target
= control target key end

     0   :  { %vm30_vm0 = vcmask 261120   ;;  %vm706_vm1 = vcmask 785408   ;;  %s3408_s3 = inlined_call_operand.vmem [shape: f32[7,32,128], index: 3, kind: input, shape index: {}]   ;;  %s3409_s0 = inlined_call_operand.vmem [shape: f32[32,32], index: 0, kind: input, shape index: {}]   ;;  %s3410_s1 = inlined_call_operand.vmem [shape: f32[32,224], index: 1, kind: input, shape index: {}]   ;;  %s3411_s5 = inlined_call_operand.vmem [shape: f32[7,128,128], index: 5, kind: input, shape index: {}]   ;;  %s3412_s4 = inlined_call_operand.vmem [shape: f32[1,128], index: 4, kind: input, shape index: {}]   ;;  %s3413_s2 = inlined_call_operand.vmem [shape: f32[32,224], index: 2, kind: input, shape index: {}]   ;;  %s3414_s6 = inlined_call_operand.vmem [shape: f32[1,128], index: 6, kind: input, shape index: {}]   ;;  %s3415_s7 = inlined_call_operand.vmem [shape: f32[32,128], index: 7, kind: output, shape index: {}]  }
   0x1   :  { %v50_v0 = vld [vmem:[%s3408_s3] sm:$0xff]  ;;  %v51_v1 = vld [vmem:[%s3408_s3 + $0x8] sm:$0xff]  ;;  %v52_v2 = vld [vmem:[%s3408_s3 + $0x10] sm:$0xff] }
   0x2   :  { %v2373_v3 = vpack.c.bf16 %v51_v1, %v50_v0  ;;  %v53_v4 = vld [vmem:[%s3408_s3 + $0x18] sm:$0xff]  ;;  %v26_v5 = vld [vmem:[%s3409_s0] sm:$0xff]  ;;  %v27_v6 = vld [vmem:[%s3409_s0 + $0x8] sm:$0xff]  ;;  %v2738_v0 = vmov 0.0|0.0  }
   0x3   :  { %v2377_v7 = vpack.c.bf16 %v53_v4, %v52_v2  ;;  %v28_v8 = vld [vmem:[%s3409_s0 + $0x10] sm:$0xff]  ;;  %v29_v9 = vld [vmem:[%s3409_s0 + $0x18] sm:$0xff]  ;;  %v31_v10 = vsel %vm30_vm0, %v26_v5, 0.0  ;;  %v32_v11 = vsel %vm30_vm0, %v27_v6, 0.0  ;;  %v1659_v12 = vld [vmem:[%s3408_s3 + $0x20] sm:$0xff] }
   0x4   :  { %2374 = vmatprep.subr.bf16.mxu0 %v2373_v3  ;;  %v33_v13 = vadd.f32 %v32_v11, %v31_v10  ;;  %v34_v14 = vsel %vm30_vm0, %v28_v8, 0.0  ;;  %v1660_v15 = vld [vmem:[%s3408_s3 + $0x28] sm:$0xff]  ;;  %v36_v16 = vsel %vm30_vm0, %v29_v9, 0.0  ;;  %v1675_v19 = vld [vmem:[%s3408_s3 + $0x60] sm:$0xff]  ;;  %v1677_v22 = vld [vmem:[%s3408_s3 + $0x70] sm:$0xff] }
   0x5   :  { %2376 = vmatpush3.bf16.msra.mxu0 %v2373_v3  ;;  %v2381_v18 = vpack.c.bf16 %v1660_v15, %v1659_v12  ;;  %v1676_v20 = vld [vmem:[%s3408_s3 + $0x68] sm:$0xff]  ;;  %v1678_v23 = vld [vmem:[%s3408_s3 + $0x78] sm:$0xff]  ;;  %v1691_v26 = vld [vmem:[%s3408_s3 + $0xa0] sm:$0xff] }
   0x6   :  { %2378 = vmatprep.subr.bf16.mxu0 %v2377_v7  ;;  %v35_v17 = vadd.f32 %v34_v14, %v33_v13  ;;  %v2397_v21 = vpack.c.bf16 %v1676_v20, %v1675_v19  ;;  %v2401_v25 = vpack.c.bf16 %v1678_v23, %v1677_v22  ;;  %v1692_v27 = vld [vmem:[%s3408_s3 + $0xa8] sm:$0xff]  ;;  %v1661_v36 = vld [vmem:[%s3408_s3 + $0x30] sm:$0xff]  ;;  %v1662_v37 = vld [vmem:[%s3408_s3 + $0x38] sm:$0xff] }
   0x7   :  { %v2413_v29 = vpack.c.bf16 %v1692_v27, %v1691_v26  ;;  %v2385_v41 = vpack.c.bf16 %v1662_v37, %v1661_v36  ;;  %v1667_v42 = vld [vmem:[%s3408_s3 + $0x40] sm:$0xff]  ;;  %v1668_v43 = vld [vmem:[%s3408_s3 + $0x48] sm:$0xff]  ;;  %v1693_v44 = vld [vmem:[%s3408_s3 + $0xb0] sm:$0xff] }
   0x8   :  { %v37_v24 = vadd.f32 %v36_v16, %v35_v17  ;;  %2398 = vmatprep.subr.bf16.mxu1 %v2397_v21  ;;  %v1694_v45 = vld [vmem:[%s3408_s3 + $0xb8] sm:$0xff]  ;;  %v2389_v47 = vpack.c.bf16 %v1668_v43, %v1667_v42  ;;  %v1669_v49 = vld [vmem:[%s3408_s3 + $0x50] sm:$0xff]  ;;  %v1683_v52 = vld [vmem:[%s3408_s3 + $0x80] sm:$0xff] }
   0x9   :  { %2380 = vmatpush3.bf16.msra.mxu0 %v2377_v7  ;;  %2400 = vmatpush3.bf16.msra.mxu1 %v2397_v21  ;;  %v2417_v48 = vpack.c.bf16 %v1694_v45, %v1693_v44  ;;  %v1670_v50 = vld [vmem:[%s3408_s3 + $0x58] sm:$0xff]  ;;  %v1684_v53 = vld [vmem:[%s3408_s3 + $0x88] sm:$0xff]  ;;  %v1685_v55 = vld [vmem:[%s3408_s3 + $0x90] sm:$0xff] }
   0xa   :  { %v38_v28 = vrot.slane %v37_v24, 4  ;;  %2382 = vmatprep.subr.bf16.mxu0 %v2381_v18  ;;  %2402 = vmatprep.subr.bf16.mxu1 %v2401_v25  ;;  %v2393_v51 = vpack.c.bf16 %v1670_v50, %v1669_v49  ;;  %v2405_v54 = vpack.c.bf16 %v1684_v53, %v1683_v52  ;;  %v1686_v56 = vld [vmem:[%s3408_s3 + $0x98] sm:$0xff]  ;;  %v1699_v58 = vld [vmem:[%s3408_s3 + $0xc0] sm:$0xff]  ;;  %v1700_v59 = vld [vmem:[%s3408_s3 + $0xc8] sm:$0xff] }
   0xb   :  { %v2409_v57 = vpack.c.bf16 %v1686_v56, %v1685_v55  ;;  %v2421_v60 = vpack.c.bf16 %v1700_v59, %v1699_v58  ;;  %v1701_v61 = vld [vmem:[%s3408_s3 + $0xd0] sm:$0xff]  ;;  %v1702_v62 = vld [vmem:[%s3408_s3 + $0xd8] sm:$0xff]  ;;  %v692_v1 = vld [vmem:[%s3410_s1 + $0x8] sm:$0xff] }
   0xc   :  { %v39_v30 = vadd.f32 %v38_v28, %v37_v24  ;;  %v2425_v63 = vpack.c.bf16 %v1702_v62, %v1701_v61  ;;  %v691_v44 = vld [vmem:[%s3410_s1] sm:$0xff]  ;;  %v694_v45 = vld [vmem:[%s3410_s1 + $0x18] sm:$0xff]  ;;  %v697_v50 = vld [vmem:[%s3410_s1 + $0x30] sm:$0xff] }
   0xd   :  { %2404 = vmatpush3.bf16.msra.mxu1 %v2401_v25  ;;  %v698_v49 = vld [vmem:[%s3410_s1 + $0x38] sm:$0xff]  ;;  %v823_v52 = vld [vmem:[%s3411_s5 + $0x8] sm:$0xff]  ;;  %v1712_v53 = vld [vmem:[%s3411_s5 + $0x80] sm:$0xff] }
   0xe   :  { %v40_v31 = vrot.slane %v39_v30, 2  ;;  %2414 = vmatprep.subr.bf16.mxu1 %v2413_v29  ;;  %v1713_v55 = vld [vmem:[%s3411_s5 + $0x88] sm:$0xff]  ;;  %v825_v58 = vld [vmem:[%s3411_s5 + $0x18] sm:$0xff]  ;;  %v1714_v59 = vld [vmem:[%s3411_s5 + $0x90] sm:$0xff] }
   0xf   :  { %v2503_v56 = vpack.c.bf16 %v1713_v55, %v1712_v53  ;;  %v1715_v61 = vld [vmem:[%s3411_s5 + $0x98] sm:$0xff] }
  0x10   :  { %v41_v32 = vadd.f32 %v40_v31, %v39_v30  ;;  %v2507_v62 = vpack.c.bf16 %v1715_v61, %v1714_v59 }
  0x12   :  { %v42_v33 = vrot.slane %v41_v32, 1 }
  0x14   :  { %v43_v34 = vadd.f32 %v42_v33, %v41_v32 }
  0x16   :  { %v45_v35 = vmul.f32 0.03125, %v43_v34 }
  0x18   :  { %v2837_v38 = vadd.f32 %v45_v35, %v26_v5  ;;  %v2839_v39 = vadd.f32 %v45_v35, %v27_v6  ;;  %v2841_v40 = vadd.f32 %v45_v35, %v28_v8  ;;  %v49_v46 = vadd.f32 %v45_v35, %v29_v9 }
  0x1a   :  { %2017 = vmatprep.mubr.msk.f32.mxu0 %vm30_vm0, %v2837_v38  ;;  %2059 = vmatprep.mubr.msk.f32.mxu1 %vm30_vm0, %v2837_v38 }
  0x1b   :  { %2018 = vmatmul.mubr.msk.f32.vlgmr.msra.gmra.mrb[0].mxu0 %vm30_vm0, %v2839_v39  ;;  %2060 = vmatmul.mubr.msk.f32.vlgmr.msra.gmra.mrb[0].mxu1 %vm30_vm0, %v2839_v39 }
  0x1c   :  { %2384 = vmatpush3.bf16.msra.mxu0 %v2381_v18  ;;  %2020 = vmatprep.mubr.msk.f32.mxu0 %vm30_vm0, %v2841_v40 }
  0x1d   :  { %2386 = vmatprep.subr.bf16.mxu0 %v2385_v41  ;;  %2062 = vmatprep.mubr.msk.f32.mxu1 %vm30_vm0, %v2841_v40 }
  0x1e   :  { %2416 = vmatpush3.bf16.msra.mxu1 %v2413_v29 }
  0x1f   :  { %2021 = vmatmul.mubr.msk.f32.gmra.mrb[2].mxu0 %vm30_vm0, %v49_v46  ;;  %2063 = vmatmul.mubr.msk.f32.gmra.mrb[2].mxu1 %vm30_vm0, %v49_v46 }
  0x20   :  { %2388 = vmatpush3.bf16.msra.mxu0 %v2385_v41  ;;  %2031 = vmatprep.mubr.msk.f32.mxu0 %vm30_vm0, %v2837_v38 }
  0x21   :  { %2390 = vmatprep.subr.bf16.mxu0 %v2389_v47  ;;  %2418 = vmatprep.subr.bf16.mxu1 %v2417_v48 }
  0x22   :  { %2420 = vmatpush3.bf16.msra.mxu1 %v2417_v48  ;;  %2087 = vmatprep.mubr.msk.f32.mxu1 %vm30_vm0, %v2837_v38  ;;  %v695_v48 = vld [vmem:[%s3410_s1 + $0x20] sm:$0xff] }
  0x23   :  { %2032 = vmatmul.mubr.msk.f32.vlgmr.msra.gmra.mrb[4].mxu0 %vm30_vm0, %v2839_v39  ;;  %2429 = vmatprep.subr.bf16.mxu1 %v2738_v0 }
  0x24   :  { %2392 = vmatpush3.bf16.msra.mxu0 %v2389_v47  ;;  %2034 = vmatprep.mubr.msk.f32.mxu0 %vm30_vm0, %v2841_v40  ;;  %v696_v47 = vld [vmem:[%s3410_s1 + $0x28] sm:$0xff] }
  0x25   :  { %2394 = vmatprep.subr.bf16.mxu0 %v2393_v51  ;;  %2088 = vmatmul.mubr.msk.f32.vlgmr.msra.gmra.mrb[4].mxu1 %vm30_vm0, %v2839_v39 }
  0x26   :  { %2090 = vmatprep.mubr.msk.f32.mxu1 %vm30_vm0, %v2841_v40 }
  0x27   :  { %2035 = vmatmul.mubr.msk.f32.gmra.mrb[6].mxu0 %vm30_vm0, %v49_v46 }
  0x28   :  { %2396 = vmatpush3.bf16.msra.mxu0 %v2393_v51  ;;  %2045 = vmatprep.mubr.msk.f32.mxu0 %vm30_vm0, %v2837_v38  ;;  %v822_v51 = vld [vmem:[%s3411_s5] sm:$0xff] }
  0x29   :  { %2406 = vmatprep.subr.bf16.mxu0 %v2405_v54  ;;  %2091 = vmatmul.mubr.msk.f32.gmra.mrb[6].mxu1 %vm30_vm0, %v49_v46 }
  0x2a   :  { %1708 = vmatprep.mubr.msk.f32.mxu1 %vm706_vm1, %v692_v1  ;;  %v827_v1 = vld [vmem:[%s3411_s5 + $0x28] sm:$0xff] }
  0x2b   :  { %2046 = vmatmul.mubr.msk.f32.vlgmr.msra.gmra.mrb[8].mxu0 %vm30_vm0, %v2839_v39 }
  0x2c   :  { %2048 = vmatprep.mubr.msk.f32.mxu0 %vm30_vm0, %v2841_v40  ;;  %2408 = vmatpush3.bf16.msra.mxu0 %v2405_v54  ;;  %v2471_v54 = vpack.c.bf16 %v823_v52, %v822_v51 }
  0x2d   :  { %2410 = vmatprep.subr.bf16.mxu0 %v2409_v57 }
  0x2f   :  { %2049 = vmatmul.mubr.msk.f32.gmra.mrb[10].mxu0 %vm30_vm0, %v49_v46 }
  0x30   :  { %2412 = vmatpush3.bf16.msra.mxu0 %v2409_v57  ;;  %2073 = vmatprep.mubr.msk.f32.mxu0 %vm30_vm0, %v2837_v38  ;;  %v824_v57 = vld [vmem:[%s3411_s5 + $0x10] sm:$0xff] }
  0x31   :  { %2422 = vmatprep.subr.bf16.mxu0 %v2421_v60 }
  0x33   :  { %2074 = vmatmul.mubr.msk.f32.vlgmr.msra.gmra.mrb[12].mxu0 %vm30_vm0, %v2839_v39 }
  0x34   :  { %2076 = vmatprep.mubr.msk.f32.mxu0 %vm30_vm0, %v2841_v40  ;;  %2424 = vmatpush3.bf16.msra.mxu0 %v2421_v60  ;;  %v2475_v60 = vpack.c.bf16 %v825_v58, %v824_v57 }
  0x35   :  { %2426 = vmatprep.subr.bf16.mxu0 %v2425_v63 }
  0x37   :  { %2077 = vmatmul.mubr.msk.f32.gmra.mrb[14].mxu0 %vm30_vm0, %v49_v46 }
  0x38   :  { %2428 = vmatpush3.bf16.msra.mxu0 %v2425_v63  ;;  %2101 = vmatprep.mubr.msk.f32.mxu0 %vm30_vm0, %v2837_v38  ;;  %v826_v63 = vld [vmem:[%s3411_s5 + $0x20] sm:$0xff] }
  0x39   :  { %2504 = vmatprep.subr.bf16.mxu0 %v2503_v56 }
  0x3b   :  { %2102 = vmatmul.mubr.msk.f32.vlgmr.msra.gmra.mrb[16].mxu0 %vm30_vm0, %v2839_v39 }
  0x3c   :  { %2104 = vmatprep.mubr.msk.f32.mxu0 %vm30_vm0, %v2841_v40  ;;  %2506 = vmatpush3.bf16.msra.mxu0 %v2503_v56 }
  0x3d   :  { %2508 = vmatprep.subr.bf16.mxu0 %v2507_v62 }
  0x3f   :  { %2105 = vmatmul.mubr.msk.f32.gmra.mrb[18].mxu0 %vm30_vm0, %v49_v46  ;;  %v693_v46 = vld [vmem:[%s3410_s1 + $0x10] sm:$0xff] }
  0x40   :  { %2510 = vmatpush3.bf16.msra.mxu0 %v2507_v62 }
  0xee   :  { %v2019_v2 = vpop.f32.mrb[0].mxu0  ;;  %v2061_v3 = vpop.f32.mrb[0].mxu1 }
  0xef   :  { %v132_v4 = vpop.f32.mrb[1].mxu0  ;;  %v402_v5 = vpop.f32.mrb[1].mxu1 }
  0xf0   :  { %v2430_v6 = vpack.c.bf16 %v2019_v2, %v132_v4  ;;  %v2448_v7 = vpack.c.bf16 %v2061_v3, %v402_v5  ;;  %v1716_v2 = vld [vmem:[%s3411_s5 + $0xa0] sm:$0xff]  ;;  %v2479_v3 = vpack.c.bf16 %v827_v1, %v826_v63  ;;  %v1717_v4 = vld [vmem:[%s3411_s5 + $0xa8] sm:$0xff] }
  0xf1   :  { %v2511_v5 = vpack.c.bf16 %v1717_v4, %v1716_v2 }
  0xf2   :  { %v2022_v8 = vpop.f32.mrb[2].mxu0  ;;  %2431 = vmatpush1.bf16.msra.mxu1 %v2430_v6  ;;  %v2064_v9 = vpop.f32.mrb[2].mxu1  ;;  %v828_v6 = vld [vmem:[%s3411_s5 + $0x30] sm:$0xff] }
  0xf3   :  { %v142_v10 = vpop.f32.mrb[3].mxu0  ;;  %2432 = vmatprep.subr.bf16.mxu1 %v2738_v0  ;;  %v412_v11 = vpop.f32.mrb[3].mxu1  ;;  %2512 = vmatprep.subr.bf16.mxu0 %v2511_v5 }
  0xf4   :  { %v2433_v12 = vpack.c.bf16 %v2022_v8, %v142_v10  ;;  %v2451_v13 = vpack.c.bf16 %v2064_v9, %v412_v11  ;;  %v1718_v8 = vld [vmem:[%s3411_s5 + $0xb0] sm:$0xff]  ;;  %2514 = vmatpush3.bf16.msra.mxu0 %v2511_v5  ;;  %v1719_v10 = vld [vmem:[%s3411_s5 + $0xb8] sm:$0xff] }
  0xf5   :  { %v2515_v11 = vpack.c.bf16 %v1719_v10, %v1718_v8  ;;  %v1746_v8 = vld [vmem:[%s3411_s5 + $0x190] sm:$0xff] }
  0xf6   :  { %v2033_v14 = vpop.f32.mrb[4].mxu0  ;;  %2434 = vmatpush1.bf16.msra.mxu1 %v2433_v12  ;;  %v830_v12 = vld [vmem:[%s3411_s5 + $0x40] sm:$0xff] }
  0xf7   :  { %v222_v15 = vpop.f32.mrb[5].mxu0  ;;  %2435 = vmatprep.subr.bf16.mxu1 %v2738_v0  ;;  %2516 = vmatprep.subr.bf16.mxu0 %v2515_v11 }
  0xf8   :  { %v2436_v16 = vpack.c.bf16 %v2033_v14, %v222_v15  ;;  %v2089_v17 = vpop.f32.mrb[4].mxu1  ;;  %v1720_v14 = vld [vmem:[%s3411_s5 + $0xc0] sm:$0xff]  ;;  %2518 = vmatpush3.bf16.msra.mxu0 %v2515_v11 }
  0xf9   :  { %v582_v18 = vpop.f32.mrb[5].mxu1 }
  0xfa   :  { %v2036_v19 = vpop.f32.mrb[6].mxu0  ;;  %2437 = vmatpush1.bf16.msra.mxu1 %v2436_v16  ;;  %v2460_v20 = vpack.c.bf16 %v2089_v17, %v582_v18  ;;  %v1721_v16 = vld [vmem:[%s3411_s5 + $0xc8] sm:$0xff]  ;;  %v832_v18 = vld [vmem:[%s3411_s5 + $0x50] sm:$0xff] }
  0xfb   :  { %v232_v21 = vpop.f32.mrb[7].mxu0  ;;  %2438 = vmatprep.subr.bf16.mxu1 %v2738_v0  ;;  %v2519_v17 = vpack.c.bf16 %v1721_v16, %v1720_v14  ;;  %v1732_v14 = vld [vmem:[%s3411_s5 + $0x120] sm:$0xff]  ;;  %v1733_v16 = vld [vmem:[%s3411_s5 + $0x128] sm:$0xff] }
  0xfc   :  { %v2439_v22 = vpack.c.bf16 %v2036_v19, %v232_v21  ;;  %v2092_v23 = vpop.f32.mrb[6].mxu1  ;;  %v833_v19 = vld [vmem:[%s3411_s5 + $0x58] sm:$0xff] }
  0xfd   :  { %v592_v24 = vpop.f32.mrb[7].mxu1  ;;  %2520 = vmatprep.subr.bf16.mxu0 %v2519_v17  ;;  %v2491_v21 = vpack.c.bf16 %v833_v19, %v832_v18  ;;  %v1749_v18 = vld [vmem:[%s3411_s5 + $0x1a8] sm:$0xff] }
  0xfe   :  { %v2047_v25 = vpop.f32.mrb[8].mxu0  ;;  %2440 = vmatpush1.bf16.msra.mxu1 %v2439_v22  ;;  %v2463_v26 = vpack.c.bf16 %v2092_v23, %v592_v24  ;;  %2522 = vmatpush3.bf16.msra.mxu0 %v2519_v17  ;;  %v1723_v22 = vld [vmem:[%s3411_s5 + $0xd8] sm:$0xff]  ;;  %v834_v24 = vld [vmem:[%s3411_s5 + $0x60] sm:$0xff] }
  0xff   :  { %v312_v27 = vpop.f32.mrb[9].mxu0  ;;  %2441 = vmatprep.subr.bf16.mxu1 %v2738_v0  ;;  %v1748_v17 = vld [vmem:[%s3411_s5 + $0x1a0] sm:$0xff] }
 0x100   :  { %v2442_v28 = vpack.c.bf16 %v2047_v25, %v312_v27  ;;  %v835_v25 = vld [vmem:[%s3411_s5 + $0x68] sm:$0xff] }
 0x101   :  { %v2495_v27 = vpack.c.bf16 %v835_v25, %v834_v24  ;;  %v1750_v24 = vld [vmem:[%s3411_s5 + $0x1b0] sm:$0xff]  ;;  %v1751_v25 = vld [vmem:[%s3411_s5 + $0x1b8] sm:$0xff] }
 0x102   :  { %v2050_v29 = vpop.f32.mrb[10].mxu0  ;;  %2443 = vmatpush1.bf16.msra.mxu1 %v2442_v28  ;;  %v1725_v28 = vld [vmem:[%s3411_s5 + $0xe8] sm:$0xff] }
 0x103   :  { %v322_v30 = vpop.f32.mrb[11].mxu0  ;;  %2444 = vmatprep.subr.bf16.mxu1 %v2738_v0 }
 0x104   :  { %v2445_v31 = vpack.c.bf16 %v2050_v29, %v322_v30  ;;  %v836_v30 = vld [vmem:[%s3411_s5 + $0x70] sm:$0xff] }
 0x106   :  { %2446 = vmatpush1.bf16.msra.mxu1 %v2445_v31  ;;  %v2075_v32 = vpop.f32.mrb[12].mxu0  ;;  %v837_v31 = vld [vmem:[%s3411_s5 + $0x78] sm:$0xff] }
 0x107   :  { %2447 = vmatprep.subr.bf16.mxu1 %v2738_v0  ;;  %v492_v33 = vpop.f32.mrb[13].mxu0 }
 0x108   :  { %v2454_v34 = vpack.c.bf16 %v2075_v32, %v492_v33  ;;  %v1726_v32 = vld [vmem:[%s3411_s5 + $0xf0] sm:$0xff]  ;;  %v2499_v33 = vpack.c.bf16 %v837_v31, %v836_v30  ;;  %v1752_v30 = vld [vmem:[%s3411_s5 + $0x1c0] sm:$0xff]  ;;  %v1753_v31 = vld [vmem:[%s3411_s5 + $0x1c8] sm:$0xff] }
 0x10a   :  { %2449 = vmatpush1.bf16.msra.mxu1 %v2448_v7  ;;  %v2078_v35 = vpop.f32.mrb[14].mxu0  ;;  %v829_v7 = vld [vmem:[%s3411_s5 + $0x38] sm:$0xff] }
 0x10b   :  { %2450 = vmatprep.subr.bf16.mxu1 %v2738_v0  ;;  %v502_v36 = vpop.f32.mrb[15].mxu0  ;;  %v2483_v9 = vpack.c.bf16 %v829_v7, %v828_v6  ;;  %v1730_v6 = vld [vmem:[%s3411_s5 + $0x110] sm:$0xff]  ;;  %v1731_v7 = vld [vmem:[%s3411_s5 + $0x118] sm:$0xff] }
 0x10c   :  { %v2457_v37 = vpack.c.bf16 %v2078_v35, %v502_v36  ;;  %v1728_v36 = vld [vmem:[%s3411_s5 + $0x100] sm:$0xff] }
 0x10e   :  { %2452 = vmatpush1.bf16.msra.mxu1 %v2451_v13  ;;  %v2103_v38 = vpop.f32.mrb[16].mxu0  ;;  %v831_v13 = vld [vmem:[%s3411_s5 + $0x48] sm:$0xff] }
 0x10f   :  { %2453 = vmatprep.subr.bf16.mxu1 %v2738_v0  ;;  %v672_v39 = vpop.f32.mrb[17].mxu0  ;;  %v2487_v15 = vpack.c.bf16 %v831_v13, %v830_v12  ;;  %v2539_v12 = vpack.c.bf16 %v1731_v7, %v1730_v6  ;;  %v1766_v7 = vld [vmem:[%s3411_s5 + $0x230] sm:$0xff] }
 0x110   :  { %v2466_v40 = vpack.c.bf16 %v2103_v38, %v672_v39  ;;  %v1744_v38 = vld [vmem:[%s3411_s5 + $0x180] sm:$0xff] }
 0x112   :  { %2455 = vmatpush1.bf16.msra.mxu1 %v2454_v34  ;;  %v2106_v41 = vpop.f32.mrb[18].mxu0  ;;  %v1727_v34 = vld [vmem:[%s3411_s5 + $0xf8] sm:$0xff] }
 0x113   :  { %2456 = vmatprep.subr.bf16.mxu1 %v2738_v0  ;;  %v682_v42 = vpop.f32.mrb[19].mxu0  ;;  %v2531_v35 = vpack.c.bf16 %v1727_v34, %v1726_v32  ;;  %v1738_v34 = vld [vmem:[%s3411_s5 + $0x150] sm:$0xff] }
 0x114   :  { %v2469_v43 = vpack.c.bf16 %v2106_v41, %v682_v42 }
 0x116   :  { %2458 = vmatpush1.bf16.msra.mxu1 %v2457_v37  ;;  %v1729_v37 = vld [vmem:[%s3411_s5 + $0x108] sm:$0xff] }
 0x117   :  { %2459 = vmatprep.subr.bf16.mxu1 %v2738_v0  ;;  %v2535_v39 = vpack.c.bf16 %v1729_v37, %v1728_v36  ;;  %v1754_v36 = vld [vmem:[%s3411_s5 + $0x1d0] sm:$0xff]  ;;  %v1755_v37 = vld [vmem:[%s3411_s5 + $0x1d8] sm:$0xff] }
 0x11a   :  { %2461 = vmatpush1.bf16.msra.mxu1 %v2460_v20  ;;  %v1722_v20 = vld [vmem:[%s3411_s5 + $0xd0] sm:$0xff] }
 0x11b   :  { %2462 = vmatprep.subr.bf16.mxu1 %v2738_v0  ;;  %v2523_v23 = vpack.c.bf16 %v1723_v22, %v1722_v20  ;;  %v1734_v20 = vld [vmem:[%s3411_s5 + $0x130] sm:$0xff]  ;;  %v2575_v22 = vpack.c.bf16 %v1749_v18, %v1748_v17  ;;  %v1769_v17 = vld [vmem:[%s3411_s5 + $0x248] sm:$0xff]  ;;  %v1784_v18 = vld [vmem:[%s3411_s5 + $0x2c0] sm:$0xff] }
 0x11d   :  { %2524 = vmatprep.subr.bf16.mxu0 %v2523_v23 }
 0x11e   :  { %2464 = vmatpush1.bf16.msra.mxu1 %v2463_v26  ;;  %v1724_v26 = vld [vmem:[%s3411_s5 + $0xe0] sm:$0xff]  ;;  %2526 = vmatpush3.bf16.msra.mxu0 %v2523_v23  ;;  %v1735_v23 = vld [vmem:[%s3411_s5 + $0x138] sm:$0xff] }
 0x11f   :  { %2465 = vmatprep.subr.bf16.mxu1 %v2738_v0  ;;  %v2527_v29 = vpack.c.bf16 %v1725_v28, %v1724_v26  ;;  %v2547_v26 = vpack.c.bf16 %v1735_v23, %v1734_v20  ;;  %v1736_v28 = vld [vmem:[%s3411_s5 + $0x140] sm:$0xff]  ;;  %v1785_v20 = vld [vmem:[%s3411_s5 + $0x2c8] sm:$0xff]  ;;  %v1770_v23 = vld [vmem:[%s3411_s5 + $0x250] sm:$0xff] }
 0x121   :  { %2528 = vmatprep.subr.bf16.mxu0 %v2527_v29 }
 0x122   :  { %2467 = vmatpush1.bf16.msra.mxu1 %v2466_v40  ;;  %2530 = vmatpush3.bf16.msra.mxu0 %v2527_v29  ;;  %v1745_v40 = vld [vmem:[%s3411_s5 + $0x188] sm:$0xff] }
 0x123   :  { %2468 = vmatprep.subr.bf16.mxu1 %v2738_v0  ;;  %2532 = vmatprep.subr.bf16.mxu0 %v2531_v35  ;;  %v2567_v41 = vpack.c.bf16 %v1745_v40, %v1744_v38  ;;  %v1737_v29 = vld [vmem:[%s3411_s5 + $0x148] sm:$0xff]  ;;  %v1740_v40 = vld [vmem:[%s3411_s5 + $0x160] sm:$0xff] }
 0x124   :  { %v2551_v32 = vpack.c.bf16 %v1737_v29, %v1736_v28  ;;  %v1772_v29 = vld [vmem:[%s3411_s5 + $0x260] sm:$0xff] }
 0x126   :  { %2470 = vmatpush1.bf16.msra.mxu1 %v2469_v43  ;;  %2534 = vmatpush3.bf16.msra.mxu0 %v2531_v35  ;;  %v1739_v35 = vld [vmem:[%s3411_s5 + $0x158] sm:$0xff] }
 0x127   :  { %2472 = vmatprep.subr.bf16.mxu1 %v2471_v54  ;;  %2568 = vmatprep.subr.bf16.mxu0 %v2567_v41  ;;  %v2555_v38 = vpack.c.bf16 %v1739_v35, %v1738_v34  ;;  %v1774_v35 = vld [vmem:[%s3411_s5 + $0x270] sm:$0xff] }
 0x129   :  { %784 = vmatmul.mubr.f32.vlgmr.msra.gmra.mrb[8].mxu1 %v691_v44  ;;  %v1707_v44 = vld [vmem:[%s3412_s4] ss:$0 sm:$0xff] }
 0x12a   :  { %1709 = vmatprep.mubr.msk.f32.mxu1 %vm706_vm1, %v694_v45  ;;  %2474 = vmatpush3.bf16.msra.mxu1 %v2471_v54 }
 0x12b   :  { %2476 = vmatprep.subr.bf16.mxu1 %v2475_v60 }
 0x12d   :  { %789 = vmatmul.mubr.f32.gmra.mrb[10].mxu1 %v693_v46 }
 0x12e   :  { %1710 = vmatprep.mubr.msk.f32.mxu1 %vm706_vm1, %v696_v47  ;;  %2478 = vmatpush3.bf16.msra.mxu1 %v2475_v60 }
 0x12f   :  { %2480 = vmatprep.subr.bf16.mxu1 %v2479_v3 }
 0x131   :  { %794 = vmatmul.mubr.f32.gmra.mrb[12].mxu1 %v695_v48 }
 0x132   :  { %1711 = vmatprep.mubr.msk.f32.mxu1 %vm706_vm1, %v698_v49  ;;  %2482 = vmatpush3.bf16.msra.mxu1 %v2479_v3 }
 0x133   :  { %2484 = vmatprep.subr.bf16.mxu1 %v2483_v9 }
 0x135   :  { %799 = vmatmul.mubr.f32.gmra.mrb[14].mxu1 %v697_v50 }
 0x136   :  { %2486 = vmatpush3.bf16.msra.mxu1 %v2483_v9  ;;  %v1747_v9 = vld [vmem:[%s3411_s5 + $0x198] sm:$0xff] }
 0x137   :  { %2488 = vmatprep.subr.bf16.mxu1 %v2487_v15  ;;  %v2571_v13 = vpack.c.bf16 %v1747_v9, %v1746_v8  ;;  %v1767_v8 = vld [vmem:[%s3411_s5 + $0x238] sm:$0xff]  ;;  %v1782_v9 = vld [vmem:[%s3411_s5 + $0x2b0] sm:$0xff] }
 0x13a   :  { %2490 = vmatpush3.bf16.msra.mxu1 %v2487_v15 }
 0x13b   :  { %2492 = vmatprep.subr.bf16.mxu1 %v2491_v21 }
 0x13e   :  { %2494 = vmatpush3.bf16.msra.mxu1 %v2491_v21  ;;  %v2543_v21 = vpack.c.bf16 %v1733_v16, %v1732_v14  ;;  %v1768_v16 = vld [vmem:[%s3411_s5 + $0x240] sm:$0xff] }
 0x13f   :  { %2496 = vmatprep.subr.bf16.mxu1 %v2495_v27 }
 0x142   :  { %2498 = vmatpush3.bf16.msra.mxu1 %v2495_v27  ;;  %v2579_v27 = vpack.c.bf16 %v1751_v25, %v1750_v24  ;;  %v1771_v24 = vld [vmem:[%s3411_s5 + $0x258] sm:$0xff]  ;;  %v1786_v25 = vld [vmem:[%s3411_s5 + $0x2d0] sm:$0xff] }
 0x143   :  { %2500 = vmatprep.subr.bf16.mxu1 %v2499_v33 }
 0x146   :  { %2502 = vmatpush3.bf16.msra.mxu1 %v2499_v33  ;;  %v2583_v33 = vpack.c.bf16 %v1753_v31, %v1752_v30  ;;  %v1773_v30 = vld [vmem:[%s3411_s5 + $0x268] sm:$0xff]  ;;  %v1788_v31 = vld [vmem:[%s3411_s5 + $0x2e0] sm:$0xff] }
 0x147   :  { %2536 = vmatprep.subr.bf16.mxu1 %v2535_v39 }
 0x1fc   :  { %v785_v42 = vpop.f32.mrb[8].mxu1 }
 0x1fd   :  { %v787_v43 = vpop.f32.mrb[9].mxu1  ;;  %v786_v46 = vadd.f32 %v1707_v44, %v785_v42  ;;  %v1756_v42 = vld [vmem:[%s3411_s5 + $0x1e0] sm:$0xff] }
 0x1fe   :  { %v1757_v43 = vld [vmem:[%s3411_s5 + $0x1e8] sm:$0xff] }
 0x200   :  { %v790_v45 = vpop.f32.mrb[10].mxu1 }
 0x201   :  { %v791_v47 = vadd.f32 %v1707_v44, %v790_v45  ;;  %v792_v48 = vpop.f32.mrb[11].mxu1  ;;  %v2591_v45 = vpack.c.bf16 %v1757_v43, %v1756_v42  ;;  %v1793_v42 = vld [vmem:[%s3411_s5 + $0x308] sm:$0xff] }
 0x202   :  { %v1758_v48 = vld [vmem:[%s3411_s5 + $0x1f0] sm:$0xff] }
 0x203   :  { %v804_v49 = vadd.f32 %v791_v47, %v786_v46 }
 0x204   :  { %v795_v50 = vpop.f32.mrb[12].mxu1 }
 0x205   :  { %v796_v51 = vadd.f32 %v1707_v44, %v795_v50  ;;  %v797_v52 = vpop.f32.mrb[13].mxu1 }
 0x206   :  { %v1760_v52 = vld [vmem:[%s3411_s5 + $0x200] sm:$0xff] }
 0x207   :  { %v805_v53 = vadd.f32 %v804_v49, %v796_v51  ;;  %v1759_v49 = vld [vmem:[%s3411_s5 + $0x1f8] sm:$0xff] }
 0x208   :  { %v800_v54 = vpop.f32.mrb[14].mxu1 }
 0x209   :  { %v801_v55 = vadd.f32 %v1707_v44, %v800_v54  ;;  %v802_v56 = vpop.f32.mrb[15].mxu1  ;;  %v1776_v54 = vld [vmem:[%s3411_s5 + $0x280] sm:$0xff] }
 0x20b   :  { %v806_v57 = vadd.f32 %v805_v53, %v801_v55  ;;  %v1761_v53 = vld [vmem:[%s3411_s5 + $0x208] sm:$0xff] }
 0x20c   :  { %v2599_v56 = vpack.c.bf16 %v1761_v53, %v1760_v52  ;;  %v1800_v53 = vld [vmem:[%s3411_s5 + $0x340] sm:$0xff] }
 0x20d   :  { %v807_v58 = vrot.slane %v806_v57, 4 }
 0x20f   :  { %v808_v59 = vadd.f32 %v807_v58, %v806_v57  ;;  %v1762_v58 = vld [vmem:[%s3411_s5 + $0x210] sm:$0xff] }
 0x211   :  { %v809_v60 = vrot.slane %v808_v59, 2 }
 0x213   :  { %v810_v61 = vadd.f32 %v809_v60, %v808_v59  ;;  %v1763_v59 = vld [vmem:[%s3411_s5 + $0x218] sm:$0xff]  ;;  %v1778_v60 = vld [vmem:[%s3411_s5 + $0x290] sm:$0xff] }
 0x215   :  { %v811_v62 = vrot.slane %v810_v61, 1 }
 0x217   :  { %v812_v63 = vadd.f32 %v811_v62, %v810_v61  ;;  %v1779_v61 = vld [vmem:[%s3411_s5 + $0x298] sm:$0xff]  ;;  %v2603_v62 = vpack.c.bf16 %v1763_v59, %v1762_v58  ;;  %v1804_v58 = vld [vmem:[%s3411_s5 + $0x360] sm:$0xff]  ;;  %v1805_v59 = vld [vmem:[%s3411_s5 + $0x368] sm:$0xff] }
 0x219   :  { %v813_v1 = vmul.f32 0.03125, %v812_v63  ;;  %v2635_v63 = vpack.c.bf16 %v1779_v61, %v1778_v60  ;;  %v2687_v60 = vpack.c.bf16 %v1805_v59, %v1804_v58  ;;  %v1806_v61 = vld [vmem:[%s3411_s5 + $0x370] sm:$0xff] }
 0x21b   :  { %v814_v2 = vadd.f32 %v813_v1, %v786_v46  ;;  %v815_v3 = vadd.f32 %v813_v1, %v791_v47  ;;  %v816_v4 = vadd.f32 %v813_v1, %v796_v51  ;;  %v817_v5 = vadd.f32 %v813_v1, %v801_v55  ;;  %v1742_v46 = vld [vmem:[%s3411_s5 + $0x170] sm:$0xff]  ;;  %v1743_v47 = vld [vmem:[%s3411_s5 + $0x178] sm:$0xff]  ;;  %v1777_v55 = vld [vmem:[%s3411_s5 + $0x288] sm:$0xff] }
 0x21c   :  { %v2563_v50 = vpack.c.bf16 %v1743_v47, %v1742_v46  ;;  %v2595_v51 = vpack.c.bf16 %v1759_v49, %v1758_v48  ;;  %v2631_v57 = vpack.c.bf16 %v1777_v55, %v1776_v54  ;;  %v1764_v1 = vld [vmem:[%s3411_s5 + $0x220] sm:$0xff]  ;;  %v1797_v48 = vld [vmem:[%s3411_s5 + $0x328] sm:$0xff] }
 0x21d   :  { %v3099_v10 = vmax.f32 %v814_v2, 0.0  ;;  %v3101_v11 = vmax.f32 %v815_v3, 0.0  ;;  %v3108_v15 = vmax.f32 %v816_v4, 0.0  ;;  %v3121_v19 = vmax.f32 %v817_v5, 0.0  ;;  %v1765_v2 = vld [vmem:[%s3411_s5 + $0x228] sm:$0xff]  ;;  %v1780_v3 = vld [vmem:[%s3411_s5 + $0x2a0] sm:$0xff] }
 0x21e   :  { %v1781_v4 = vld [vmem:[%s3411_s5 + $0x2a8] sm:$0xff]  ;;  %v2607_v5 = vpack.c.bf16 %v1765_v2, %v1764_v1  ;;  %v1796_v47 = vld [vmem:[%s3411_s5 + $0x320] sm:$0xff] }
 0x21f   :  { %2139 = vmatprep.mubr.f32.mxu1 %v3099_v10  ;;  %2177 = vmatprep.mubr.f32.mxu0 %v3099_v10  ;;  %v2639_v6 = vpack.c.bf16 %v1781_v4, %v1780_v3  ;;  %v2671_v49 = vpack.c.bf16 %v1797_v48, %v1796_v47  ;;  %v1801_v54 = vld [vmem:[%s3411_s5 + $0x348] sm:$0xff]  ;;  %v1537_v47 = vld [vmem:[%s3413_s2 + $0x10] sm:$0xff]  ;;  %v1539_v48 = vld [vmem:[%s3413_s2 + $0x20] sm:$0xff] }
 0x220   :  { %2140 = vmatmul.mubr.f32.vlgmr.msra.gmra.mrb[16].mxu1 %v3101_v11  ;;  %2178 = vmatmul.mubr.f32.vlgmr.msra.gmra.mrb[20].mxu0 %v3101_v11  ;;  %v2679_v55 = vpack.c.bf16 %v1801_v54, %v1800_v53  ;;  %v1536_v1 = vld [vmem:[%s3413_s2 + $0x8] sm:$0xff] }
 0x221   :  { %2538 = vmatpush3.bf16.msra.mxu1 %v2535_v39  ;;  %2570 = vmatpush3.bf16.msra.mxu0 %v2567_v41  ;;  %v2587_v39 = vpack.c.bf16 %v1755_v37, %v1754_v36  ;;  %v1741_v41 = vld [vmem:[%s3411_s5 + $0x168] sm:$0xff]  ;;  %v1775_v36 = vld [vmem:[%s3411_s5 + $0x278] sm:$0xff]  ;;  %v1790_v37 = vld [vmem:[%s3411_s5 + $0x2f0] sm:$0xff] }
 0x222   :  { %2142 = vmatprep.mubr.f32.mxu1 %v3108_v15  ;;  %2180 = vmatprep.mubr.f32.mxu0 %v3108_v15  ;;  %v2559_v44 = vpack.c.bf16 %v1741_v41, %v1740_v40  ;;  %v1792_v41 = vld [vmem:[%s3411_s5 + $0x300] sm:$0xff] }
 0x223   :  { %2540 = vmatprep.subr.bf16.mxu1 %v2539_v12  ;;  %2572 = vmatprep.subr.bf16.mxu0 %v2571_v13  ;;  %v2663_v43 = vpack.c.bf16 %v1793_v42, %v1792_v41 }
 0x224   :  { %2143 = vmatmul.mubr.f32.gmra.mrb[18].mxu1 %v3121_v19  ;;  %2181 = vmatmul.mubr.f32.gmra.mrb[22].mxu0 %v3121_v19 }
 0x225   :  { %2542 = vmatpush3.bf16.msra.mxu1 %v2539_v12  ;;  %2574 = vmatpush3.bf16.msra.mxu0 %v2571_v13  ;;  %v1783_v12 = vld [vmem:[%s3411_s5 + $0x2b8] sm:$0xff]  ;;  %v2611_v13 = vpack.c.bf16 %v1767_v8, %v1766_v7 }
 0x226   :  { %2215 = vmatprep.mubr.f32.mxu1 %v3099_v10  ;;  %2253 = vmatprep.mubr.f32.mxu0 %v3099_v10  ;;  %v2643_v14 = vpack.c.bf16 %v1783_v12, %v1782_v9 }
 0x227   :  { %2544 = vmatprep.subr.bf16.mxu1 %v2543_v21  ;;  %2576 = vmatprep.subr.bf16.mxu0 %v2575_v22 }
 0x229   :  { %2546 = vmatpush3.bf16.msra.mxu1 %v2543_v21  ;;  %2578 = vmatpush3.bf16.msra.mxu0 %v2575_v22  ;;  %v2615_v21 = vpack.c.bf16 %v1769_v17, %v1768_v16  ;;  %v2647_v22 = vpack.c.bf16 %v1785_v20, %v1784_v18 }
 0x22a   :  { %2548 = vmatprep.subr.bf16.mxu1 %v2547_v26  ;;  %2580 = vmatprep.subr.bf16.mxu0 %v2579_v27 }
 0x22d   :  { %2550 = vmatpush3.bf16.msra.mxu1 %v2547_v26  ;;  %2582 = vmatpush3.bf16.msra.mxu0 %v2579_v27  ;;  %v1787_v26 = vld [vmem:[%s3411_s5 + $0x2d8] sm:$0xff]  ;;  %v2619_v27 = vpack.c.bf16 %v1771_v24, %v1770_v23 }
 0x22e   :  { %2552 = vmatprep.subr.bf16.mxu1 %v2551_v32  ;;  %2584 = vmatprep.subr.bf16.mxu0 %v2583_v33  ;;  %v2651_v28 = vpack.c.bf16 %v1787_v26, %v1786_v25 }
 0x231   :  { %2554 = vmatpush3.bf16.msra.mxu1 %v2551_v32  ;;  %2586 = vmatpush3.bf16.msra.mxu0 %v2583_v33  ;;  %v1789_v32 = vld [vmem:[%s3411_s5 + $0x2e8] sm:$0xff]  ;;  %v2623_v33 = vpack.c.bf16 %v1773_v30, %v1772_v29 }
 0x232   :  { %2556 = vmatprep.subr.bf16.mxu1 %v2555_v38  ;;  %2588 = vmatprep.subr.bf16.mxu0 %v2587_v39  ;;  %v2655_v34 = vpack.c.bf16 %v1789_v32, %v1788_v31 }
 0x235   :  { %2558 = vmatpush3.bf16.msra.mxu1 %v2555_v38  ;;  %2590 = vmatpush3.bf16.msra.mxu0 %v2587_v39  ;;  %v1791_v38 = vld [vmem:[%s3411_s5 + $0x2f8] sm:$0xff]  ;;  %v2627_v39 = vpack.c.bf16 %v1775_v36, %v1774_v35 }
 0x236   :  { %2560 = vmatprep.subr.bf16.mxu1 %v2559_v44  ;;  %2592 = vmatprep.subr.bf16.mxu0 %v2591_v45  ;;  %v2659_v40 = vpack.c.bf16 %v1791_v38, %v1790_v37 }
 0x239   :  { %2562 = vmatpush3.bf16.msra.mxu1 %v2559_v44  ;;  %2594 = vmatpush3.bf16.msra.mxu0 %v2591_v45  ;;  %v1794_v44 = vld [vmem:[%s3411_s5 + $0x310] sm:$0xff]  ;;  %v1795_v45 = vld [vmem:[%s3411_s5 + $0x318] sm:$0xff] }
 0x23a   :  { %2564 = vmatprep.subr.bf16.mxu1 %v2563_v50  ;;  %2596 = vmatprep.subr.bf16.mxu0 %v2595_v51  ;;  %v2667_v46 = vpack.c.bf16 %v1795_v45, %v1794_v44  ;;  %v1535_v45 = vld [vmem:[%s3413_s2] sm:$0xff] }
 0x23d   :  { %2566 = vmatpush3.bf16.msra.mxu1 %v2563_v50  ;;  %2598 = vmatpush3.bf16.msra.mxu0 %v2595_v51  ;;  %v1798_v50 = vld [vmem:[%s3411_s5 + $0x330] sm:$0xff]  ;;  %v1799_v51 = vld [vmem:[%s3411_s5 + $0x338] sm:$0xff] }
 0x23e   :  { %2600 = vmatprep.subr.bf16.mxu1 %v2599_v56  ;;  %2632 = vmatprep.subr.bf16.mxu0 %v2631_v57  ;;  %v2675_v52 = vpack.c.bf16 %v1799_v51, %v1798_v50  ;;  %v1541_v50 = vld [vmem:[%s3413_s2 + $0x30] sm:$0xff]  ;;  %v1808_v51 = vld [vmem:[%s3414_s6] ss:$0 sm:$0xff] }
 0x240   :  { %2216 = vmatmul.mubr.f32.vlgmr.msra.gmra.mrb[20].mxu1 %v3101_v11  ;;  %2254 = vmatmul.mubr.f32.vlgmr.msra.gmra.mrb[24].mxu0 %v3101_v11 }
 0x241   :  { %2218 = vmatprep.mubr.f32.mxu1 %v3108_v15  ;;  %2256 = vmatprep.mubr.f32.mxu0 %v3108_v15 }
 0x242   :  { %2602 = vmatpush3.bf16.msra.mxu1 %v2599_v56  ;;  %2634 = vmatpush3.bf16.msra.mxu0 %v2631_v57  ;;  %v1802_v56 = vld [vmem:[%s3411_s5 + $0x350] sm:$0xff] }
 0x243   :  { %2604 = vmatprep.subr.bf16.mxu1 %v2603_v62  ;;  %2636 = vmatprep.subr.bf16.mxu0 %v2635_v63 }
 0x244   :  { %2219 = vmatmul.mubr.f32.gmra.mrb[22].mxu1 %v3121_v19  ;;  %2257 = vmatmul.mubr.f32.gmra.mrb[26].mxu0 %v3121_v19 }
 0x245   :  { %2291 = vmatprep.mubr.f32.mxu1 %v3099_v10  ;;  %2329 = vmatprep.mubr.f32.mxu0 %v3099_v10 }
 0x246   :  { %2606 = vmatpush3.bf16.msra.mxu1 %v2603_v62  ;;  %2638 = vmatpush3.bf16.msra.mxu0 %v2635_v63  ;;  %v1807_v62 = vld [vmem:[%s3411_s5 + $0x378] sm:$0xff] }
 0x247   :  { %2608 = vmatprep.subr.bf16.mxu1 %v2607_v5  ;;  %2640 = vmatprep.subr.bf16.mxu0 %v2639_v6  ;;  %v2691_v63 = vpack.c.bf16 %v1807_v62, %v1806_v61 }
 0x24a   :  { %2610 = vmatpush3.bf16.msra.mxu1 %v2607_v5  ;;  %2642 = vmatpush3.bf16.msra.mxu0 %v2639_v6 }
 0x24b   :  { %2612 = vmatprep.subr.bf16.mxu1 %v2611_v13  ;;  %2644 = vmatprep.subr.bf16.mxu0 %v2643_v14 }
 0x24e   :  { %2614 = vmatpush3.bf16.msra.mxu1 %v2611_v13  ;;  %2646 = vmatpush3.bf16.msra.mxu0 %v2643_v14 }
 0x24f   :  { %2616 = vmatprep.subr.bf16.mxu1 %v2615_v21  ;;  %2648 = vmatprep.subr.bf16.mxu0 %v2647_v22 }
 0x252   :  { %2618 = vmatpush3.bf16.msra.mxu1 %v2615_v21  ;;  %2650 = vmatpush3.bf16.msra.mxu0 %v2647_v22 }
 0x253   :  { %2620 = vmatprep.subr.bf16.mxu1 %v2619_v27  ;;  %2652 = vmatprep.subr.bf16.mxu0 %v2651_v28 }
 0x256   :  { %2622 = vmatpush3.bf16.msra.mxu1 %v2619_v27  ;;  %2654 = vmatpush3.bf16.msra.mxu0 %v2651_v28 }
 0x257   :  { %2624 = vmatprep.subr.bf16.mxu1 %v2623_v33  ;;  %2656 = vmatprep.subr.bf16.mxu0 %v2655_v34 }
 0x25a   :  { %2626 = vmatpush3.bf16.msra.mxu1 %v2623_v33  ;;  %2658 = vmatpush3.bf16.msra.mxu0 %v2655_v34 }
 0x25b   :  { %2628 = vmatprep.subr.bf16.mxu1 %v2627_v39  ;;  %2660 = vmatprep.subr.bf16.mxu0 %v2659_v40 }
 0x25e   :  { %2630 = vmatpush3.bf16.msra.mxu1 %v2627_v39  ;;  %2662 = vmatpush3.bf16.msra.mxu0 %v2659_v40 }
 0x25f   :  { %2664 = vmatprep.subr.bf16.mxu1 %v2663_v43  ;;  %2695 = vmatprep.subr.bf16.mxu0 %v2738_v0 }
 0x261   :  { %2292 = vmatmul.mubr.f32.vlgmr.msra.gmra.mrb[24].mxu1 %v3101_v11  ;;  %2330 = vmatmul.mubr.f32.vlgmr.msra.gmra.mrb[28].mxu0 %v3101_v11 }
 0x262   :  { %2294 = vmatprep.mubr.f32.mxu1 %v3108_v15  ;;  %2332 = vmatprep.mubr.f32.mxu0 %v3108_v15 }
 0x263   :  { %2666 = vmatpush3.bf16.msra.mxu1 %v2663_v43 }
 0x264   :  { %2668 = vmatprep.subr.bf16.mxu1 %v2667_v46 }
 0x265   :  { %2295 = vmatmul.mubr.f32.gmra.mrb[26].mxu1 %v3121_v19  ;;  %2333 = vmatmul.mubr.f32.gmra.mrb[30].mxu0 %v3121_v19 }
 0x266   :  { %2367 = vmatprep.mubr.f32.mxu1 %v3099_v10  ;;  %v1803_v10 = vld [vmem:[%s3411_s5 + $0x358] sm:$0xff]  ;;  %1809 = vmatprep.mubr.msk.f32.mxu0 %vm706_vm1, %v1536_v1 }
 0x267   :  { %2670 = vmatpush3.bf16.msra.mxu1 %v2667_v46  ;;  %v2683_v57 = vpack.c.bf16 %v1803_v10, %v1802_v56  ;;  %v1538_v46 = vld [vmem:[%s3413_s2 + $0x18] sm:$0xff] }
 0x268   :  { %2672 = vmatprep.subr.bf16.mxu1 %v2671_v49 }
 0x26b   :  { %2674 = vmatpush3.bf16.msra.mxu1 %v2671_v49  ;;  %v1542_v49 = vld [vmem:[%s3413_s2 + $0x38] sm:$0xff] }
 0x26c   :  { %2676 = vmatprep.subr.bf16.mxu1 %v2675_v52 }
 0x26f   :  { %2678 = vmatpush3.bf16.msra.mxu1 %v2675_v52 }
 0x270   :  { %2680 = vmatprep.subr.bf16.mxu1 %v2679_v55 }
 0x273   :  { %2682 = vmatpush3.bf16.msra.mxu1 %v2679_v55 }
 0x274   :  { %2684 = vmatprep.subr.bf16.mxu1 %v2683_v57 }
 0x277   :  { %2686 = vmatpush3.bf16.msra.mxu1 %v2683_v57 }
 0x278   :  { %2688 = vmatprep.subr.bf16.mxu1 %v2687_v60 }
 0x27b   :  { %2690 = vmatpush3.bf16.msra.mxu1 %v2687_v60 }
 0x27c   :  { %2692 = vmatprep.subr.bf16.mxu1 %v2691_v63 }
 0x27f   :  { %2694 = vmatpush3.bf16.msra.mxu1 %v2691_v63 }
 0x282   :  { %2368 = vmatmul.mubr.f32.vlgmr.msra.gmra.mrb[28].mxu1 %v3101_v11 }
 0x283   :  { %2370 = vmatprep.mubr.f32.mxu1 %v3108_v15 }
 0x286   :  { %2371 = vmatmul.mubr.f32.gmra.mrb[30].mxu1 %v3121_v19 }
 0x2f3   :  { %v2141_v2 = vpop.f32.mrb[16].mxu1  ;;  %v2179_v3 = vpop.f32.mrb[20].mxu0 }
 0x2f4   :  { %v904_v4 = vpop.f32.mrb[17].mxu1  ;;  %v1006_v5 = vpop.f32.mrb[21].mxu0 }
 0x2f5   :  { %v2696_v6 = vpack.c.bf16 %v2141_v2, %v904_v4  ;;  %v2702_v7 = vpack.c.bf16 %v2179_v3, %v1006_v5 }
 0x2f7   :  { %v2144_v8 = vpop.f32.mrb[18].mxu1  ;;  %v2182_v9 = vpop.f32.mrb[22].mxu0  ;;  %2697 = vmatpush1.bf16.msra.mxu0 %v2696_v6 }
 0x2f8   :  { %v914_v11 = vpop.f32.mrb[19].mxu1  ;;  %v1016_v12 = vpop.f32.mrb[23].mxu0  ;;  %2698 = vmatprep.subr.bf16.mxu0 %v2738_v0 }
 0x2f9   :  { %v2699_v15 = vpack.c.bf16 %v2144_v8, %v914_v11  ;;  %v2705_v19 = vpack.c.bf16 %v2182_v9, %v1016_v12 }
 0x2fb   :  { %2700 = vmatpush1.bf16.msra.mxu0 %v2699_v15 }
 0x2fc   :  { %2701 = vmatprep.subr.bf16.mxu0 %v2738_v0 }
 0x2ff   :  { %2703 = vmatpush1.bf16.msra.mxu0 %v2702_v7 }
 0x300   :  { %2704 = vmatprep.subr.bf16.mxu0 %v2738_v0 }
 0x303   :  { %2706 = vmatpush1.bf16.msra.mxu0 %v2705_v19 }
 0x304   :  { %2707 = vmatprep.subr.bf16.mxu0 %v2738_v0 }
 0x313   :  { %v2217_v13 = vpop.f32.mrb[20].mxu1  ;;  %v2255_v14 = vpop.f32.mrb[24].mxu0 }
 0x314   :  { %v1108_v16 = vpop.f32.mrb[21].mxu1  ;;  %v1210_v17 = vpop.f32.mrb[25].mxu0 }
 0x315   :  { %v2708_v18 = vpack.c.bf16 %v2217_v13, %v1108_v16  ;;  %v2714_v20 = vpack.c.bf16 %v2255_v14, %v1210_v17 }
 0x317   :  { %v2220_v21 = vpop.f32.mrb[22].mxu1  ;;  %v2258_v22 = vpop.f32.mrb[26].mxu0  ;;  %2709 = vmatpush1.bf16.msra.mxu0 %v2708_v18 }
 0x318   :  { %v1118_v23 = vpop.f32.mrb[23].mxu1  ;;  %v1220_v24 = vpop.f32.mrb[27].mxu0  ;;  %2710 = vmatprep.subr.bf16.mxu0 %v2738_v0 }
 0x319   :  { %v2711_v25 = vpack.c.bf16 %v2220_v21, %v1118_v23  ;;  %v2717_v26 = vpack.c.bf16 %v2258_v22, %v1220_v24 }
 0x31b   :  { %2712 = vmatpush1.bf16.msra.mxu0 %v2711_v25 }
 0x31c   :  { %2713 = vmatprep.subr.bf16.mxu0 %v2738_v0 }
 0x31f   :  { %2715 = vmatpush1.bf16.msra.mxu0 %v2714_v20 }
 0x320   :  { %2716 = vmatprep.subr.bf16.mxu0 %v2738_v0 }
 0x323   :  { %2718 = vmatpush1.bf16.msra.mxu0 %v2717_v26 }
 0x324   :  { %2719 = vmatprep.subr.bf16.mxu0 %v2738_v0 }
 0x334   :  { %v2293_v27 = vpop.f32.mrb[24].mxu1  ;;  %v2331_v28 = vpop.f32.mrb[28].mxu0 }
 0x335   :  { %v1312_v29 = vpop.f32.mrb[25].mxu1  ;;  %v1414_v30 = vpop.f32.mrb[29].mxu0 }
 0x336   :  { %v2720_v31 = vpack.c.bf16 %v2293_v27, %v1312_v29  ;;  %v2726_v32 = vpack.c.bf16 %v2331_v28, %v1414_v30 }
 0x338   :  { %v2296_v33 = vpop.f32.mrb[26].mxu1  ;;  %v2334_v34 = vpop.f32.mrb[30].mxu0  ;;  %2721 = vmatpush1.bf16.msra.mxu0 %v2720_v31 }
 0x339   :  { %v1322_v35 = vpop.f32.mrb[27].mxu1  ;;  %v1424_v36 = vpop.f32.mrb[31].mxu0  ;;  %2722 = vmatprep.subr.bf16.mxu0 %v2738_v0 }
 0x33a   :  { %v2723_v37 = vpack.c.bf16 %v2296_v33, %v1322_v35  ;;  %v2729_v38 = vpack.c.bf16 %v2334_v34, %v1424_v36 }
 0x33c   :  { %2724 = vmatpush1.bf16.msra.mxu0 %v2723_v37 }
 0x33d   :  { %2725 = vmatprep.subr.bf16.mxu0 %v2738_v0 }
 0x340   :  { %2727 = vmatpush1.bf16.msra.mxu0 %v2726_v32 }
 0x341   :  { %2728 = vmatprep.subr.bf16.mxu0 %v2738_v0 }
 0x344   :  { %2730 = vmatpush1.bf16.msra.mxu0 %v2729_v38 }
 0x345   :  { %2731 = vmatprep.subr.bf16.mxu0 %v2738_v0 }
 0x355   :  { %v2369_v39 = vpop.f32.mrb[28].mxu1 }
 0x356   :  { %v1516_v40 = vpop.f32.mrb[29].mxu1 }
 0x357   :  { %v2732_v41 = vpack.c.bf16 %v2369_v39, %v1516_v40 }
 0x359   :  { %v2372_v42 = vpop.f32.mrb[30].mxu1  ;;  %2733 = vmatpush1.bf16.msra.mxu0 %v2732_v41 }
 0x35a   :  { %v1526_v43 = vpop.f32.mrb[31].mxu1  ;;  %2734 = vmatprep.subr.bf16.mxu0 %v2738_v0  ;;  %v1540_v0 = vld [vmem:[%s3413_s2 + $0x28] sm:$0xff] }
 0x35b   :  { %v2735_v44 = vpack.c.bf16 %v2372_v42, %v1526_v43 }
 0x35d   :  { %2736 = vmatpush1.bf16.msra.mxu0 %v2735_v44 }
 0x360   :  { %1627 = vmatmul.mubr.f32.vlgmr.msra.gmra.mrb[32].mxu0 %v1535_v45 }
 0x361   :  { %1810 = vmatprep.mubr.msk.f32.mxu0 %vm706_vm1, %v1538_v46 }
 0x364   :  { %1632 = vmatmul.mubr.f32.gmra.mrb[34].mxu0 %v1537_v47 }
 0x365   :  { %1811 = vmatprep.mubr.msk.f32.mxu0 %vm706_vm1, %v1540_v0 }
 0x368   :  { %1637 = vmatmul.mubr.f32.gmra.mrb[36].mxu0 %v1539_v48 }
 0x369   :  { %1812 = vmatprep.mubr.msk.f32.mxu0 %vm706_vm1, %v1542_v49 }
 0x36c   :  { %1642 = vmatmul.mubr.f32.gmra.mrb[38].mxu0 %v1541_v50 }
 0x433   :  { %v1628_v52 = vpop.f32.mrb[32].mxu0 }
 0x434   :  { %v1629_v53 = vadd.f32 %v1808_v51, %v1628_v52  ;;  %v1630_v54 = vpop.f32.mrb[33].mxu0 }
 0x436   :  { %1647 = vst [vmem:[%s3415_s7] sm:$0xff] %v1629_v53 }
 0x437   :  { %v1633_v55 = vpop.f32.mrb[34].mxu0 }
 0x438   :  { %v1634_v56 = vadd.f32 %v1808_v51, %v1633_v55  ;;  %v1635_v10 = vpop.f32.mrb[35].mxu0 }
 0x43a   :  { %1648 = vst [vmem:[%s3415_s7 + $0x8] sm:$0xff] %v1634_v56 }
 0x43b   :  { %v1638_v57 = vpop.f32.mrb[36].mxu0 }
 0x43c   :  { %v1639_v58 = vadd.f32 %v1808_v51, %v1638_v57  ;;  %v1640_v59 = vpop.f32.mrb[37].mxu0 }
 0x43e   :  { %1649 = vst [vmem:[%s3415_s7 + $0x10] sm:$0xff] %v1639_v58 }
 0x43f   :  { %v1643_v60 = vpop.f32.mrb[38].mxu0 }
 0x440   :  { %v1644_v61 = vadd.f32 %v1808_v51, %v1643_v60  ;;  %v1645_v62 = vpop.f32.mrb[39].mxu0 }
 0x442   :  { %1650 = vst [vmem:[%s3415_s7 + $0x18] sm:$0xff] %v1644_v61 }

</bundles_post_ra>
